<compile_context>
chip_gen: v7x
topology: tpu7x:2x2x1
jax: 0.10.0
libtpu: 0.0.40
codegen_flags: <defaults>
</compile_context>

<pallas_src>
import functools

import numpy as np
import jax
import jax.numpy as jnp
from jax import lax
from jax.experimental import pallas as pl
from jax.experimental.pallas import tpu as pltpu

EPS = 1e-5


def build_banded_weights(w_hwio, width):
    """(3,3,Cin,Cout) HWIO conv weights -> (3, W*Cin, W*Cout) block-banded matrices.

    B[ky][w_in*Cin + ci, w_out*Cout + co] = w_hwio[ky, w_in - w_out + 1, ci, co]
    for |w_in - w_out| <= 1, else 0.  Left/right conv padding is realized by the
    clipped band (out-of-image taps have no row), so the kernel only pads along H.
    """
    _, _, c_in, c_out = w_hwio.shape
    w_in = jnp.arange(width)[:, None]
    w_out = jnp.arange(width)[None, :]
    kx = w_in - w_out + 1                                    # (W, W)
    valid = ((kx >= 0) & (kx <= 2)).astype(w_hwio.dtype)
    taps = w_hwio[:, jnp.clip(kx, 0, 2), :, :]               # (3, W, W, Cin, Cout)
    taps = taps * valid[None, :, :, None, None]
    banded = jnp.transpose(taps, (0, 1, 3, 2, 4))            # (3, W, Cin, W, Cout)
    return banded.reshape(3, width * c_in, width * c_out)


def encoder_block_kernel(x_ref, b1_ref, g1_ref, be1_ref, b2_ref, g2_ref, be2_ref,
                         o_ref, x_pad_ref, h_pad_ref, *, n, h, w, c_out):
    """Whole EncoderBlock forward, fully resident in VMEM.

    x_ref    : (N, H, W*Cin)  f32   input, lanes = (w, ci)
    b1_ref   : (3, W*Cin, W*Cout)   bf16 banded conv1 weights
    b2_ref   : (3, W*Cout, W*Cout)  bf16 banded conv2 weights
    g*/be*   : (1, W*Cout)    f32   BN affine params, pre-tiled over W
    o_ref    : (N*H, W*Cout)  f32   pooled-candidate slab (valid at even h, w)
    x_pad_ref, h_pad_ref : H-zero-padded f32 VMEM scratch for the two convs
    """
    hp = h + 2
    wc = w * c_out                     # lane width of every conv output (128 here)
    rows = n * h
    m = n * h * w                      # elements per channel for the BN statistics

    def stage_h_padded(pad_ref, interior):
        # Only H needs a halo (W halo lives in the banded weights): two zero rows
        # plus one dense, lane-aligned interior store.
        zrow = jnp.zeros((n, 1, pad_ref.shape[2]), pad_ref.dtype)
        pad_ref[:, 0:1, :] = zrow
        pad_ref[:, hp - 1:hp, :] = zrow
        pad_ref[:, 1:1 + h, :] = interior

    def conv3x3(pad_ref, b_ref):
        # One lane-dense banded matmul per kernel row ky (K = W*C, Nout = W*Cout).
        k = b_ref.shape[1]
        acc = None
        for ky in range(3):
            lhs = pad_ref[:, ky:ky + h, :].reshape(rows, k).astype(jnp.bfloat16)
            p = jnp.dot(lhs, b_ref[ky], preferred_element_type=jnp.float32)
            acc = p if acc is None else acc + p
        return acc                                           # (rows, wc) f32

    def fold_w(v):
        # v: (1, wc) column sums.  Returns per-channel totals broadcast back onto
        # every (w, c) lane group.  Cyclic roll-tree (direction agnostic) when W is
        # a power of two; tiny reshape fold otherwise.
        if w & (w - 1) == 0:
            for step in range(w.bit_length() - 1):
                v = v + pltpu.roll(v, shift=c_out * (1 << step), axis=1)
            return v
        per_c = jnp.sum(v.reshape(w, c_out), axis=0, keepdims=True)
        return jnp.tile(per_c, (1, w))

    def bn_relu(acc, gamma_t, beta_t):
        # Train-mode BatchNorm (biased variance) + ReLU, all lane-dense, all f32.
        mean_t = fold_w(jnp.sum(acc, axis=0, keepdims=True)) * (1.0 / m)
        d = acc - mean_t
        var_t = fold_w(jnp.sum(d * d, axis=0, keepdims=True)) * (1.0 / m)
        scale_t = gamma_t * lax.rsqrt(var_t + EPS)
        return jnp.maximum(d * scale_t + beta_t, 0.0)        # (rows, wc) f32

    # ---- conv1 -> bn1 -> relu ----
    stage_h_padded(x_pad_ref, x_ref[...])
    h1 = bn_relu(conv3x3(x_pad_ref, b1_ref), g1_ref[...], be1_ref[...])

    # ---- conv2 -> bn2 -> relu ----
    stage_h_padded(h_pad_ref, h1.reshape(n, h, wc))
    h2 = bn_relu(conv3x3(h_pad_ref, b2_ref), g2_ref[...], be2_ref[...])

    # ---- maxpool 2x2, stride 2: lane shift by c_out + sublane shift by 1 row ----
    # Valid pooled values land at even (h, w); the wrapper subsamples them.
    w_shift = jnp.concatenate([h2[:, c_out:], h2[:, :c_out]], axis=1)
    m1 = jnp.maximum(h2, w_shift)
    h_shift = jnp.concatenate([m1[1:, :], m1[:1, :]], axis=0)
    o_ref[...] = jnp.maximum(m1, h_shift)                    # lane-dense 128-wide store


@jax.jit
def encoder_block_forward(x_nchw, params):
    """PyTorch-equivalent forward (EncoderBlock with stride=2). x is NCHW f32."""
    w1, g1, b1, w2, g2, b2 = params                # w*: (3, 3, Cin, Cout) HWIO
    n, c_in, h, w = x_nchw.shape
    c_out = w1.shape[-1]
    assert h % 2 == 0 and w % 2 == 0, "MaxPool2d(2) requires even H and W"

    # Working layout for the kernel: rows = (n, h), lanes = (w, c).
    x_rows = jnp.transpose(x_nchw, (0, 2, 3, 1)).reshape(n, h, w * c_in).astype(jnp.float32)
    b1k = build_banded_weights(w1.astype(jnp.float32), w).astype(jnp.bfloat16)
    b2k = build_banded_weights(w2.astype(jnp.float32), w).astype(jnp.bfloat16)
    g1t = jnp.tile(g1.reshape(1, c_out).astype(jnp.float32), (1, w))
    be1t = jnp.tile(b1.reshape(1, c_out).astype(jnp.float32), (1, w))
    g2t = jnp.tile(g2.reshape(1, c_out).astype(jnp.float32), (1, w))
    be2t = jnp.tile(b2.reshape(1, c_out).astype(jnp.float32), (1, w))

    kernel = functools.partial(encoder_block_kernel, n=n, h=h, w=w, c_out=c_out)
    vmem = functools.partial(pl.BlockSpec, memory_space=pltpu.MemorySpace.VMEM)

    out_rows = pl.pallas_call(
        kernel,
        out_shape=jax.ShapeDtypeStruct((n * h, w * c_out), jnp.float32),
        in_specs=[vmem() for _ in range(7)],
        out_specs=vmem(),
        scratch_shapes=[
            pltpu.VMEM((n, h + 2, w * c_in), jnp.float32),    # H-padded input
            pltpu.VMEM((n, h + 2, w * c_out), jnp.float32),   # H-padded conv1 act
        ],
        compiler_params=pltpu.CompilerParams(
            vmem_limit_bytes=32 * 1024 * 1024),
    )(x_rows, b1k, g1t, be1t, b2k, g2t, be2t)

    # Pick the even (h, w) positions and go back to NCHW: pure indexing
    # (wrapper-side layout plumbing, no compute).
    out_nhwc = out_rows.reshape(n, h, w, c_out)[:, ::2, ::2, :]
    return jnp.transpose(out_nhwc, (0, 3, 1, 2))


def reference_forward(x_nchw, params):
    """Pure-JAX reference matching the PyTorch module (train-mode BN, MaxPool2d(2)).

    Mirrors the kernel's mixed-precision policy: conv operands rounded to bf16,
    products/accumulation and all BN math in f32 (bf16 x bf16 products are exact in
    f32), so kernel-vs-reference differences are accumulation-order noise only.
    """
    w1, g1, b1, w2, g2, b2 = params

    def conv(x, w_hwio):
        xq = x.astype(jnp.bfloat16).astype(jnp.float32)
        wq = w_hwio.astype(jnp.bfloat16).astype(jnp.float32)
        w_oihw = jnp.transpose(wq, (3, 2, 0, 1))
        return lax.conv_general_dilated(
            xq, w_oihw, window_strides=(1, 1), padding=((1, 1), (1, 1)),
            dimension_numbers=('NCHW', 'OIHW', 'NCHW'),
            precision=lax.Precision.HIGHEST)

    def bn_relu(x, g, b):
        mean = jnp.mean(x, axis=(0, 2, 3), keepdims=True)
        var = jnp.mean((x - mean) ** 2, axis=(0, 2, 3), keepdims=True)
        y = (x - mean) * lax.rsqrt(var + EPS)
        y = y * g.reshape(1, -1, 1, 1) + b.reshape(1, -1, 1, 1)
        return jnp.maximum(y, 0.0)

    y = bn_relu(conv(x_nchw, w1), g1, b1)
    y = bn_relu(conv(y, w2), g2, b2)
    return lax.reduce_window(y, -jnp.inf, lax.max,
                             (1, 1, 2, 2), (1, 1, 2, 2), 'VALID')


if __name__ == "__main__":
    key = jax.random.PRNGKey(0)
    kx, k1, kg1, kb1, k2, kg2, kb2 = jax.random.split(key, 7)

    N, Cin, Cout, H, W = 2, 4, 8, 16, 16            # EncoderBlock(4, 8, stride=2)
    x = jax.random.normal(kx, (N, Cin, H, W), jnp.float32)

    # deterministic synthetic parameters (kaiming-ish scale for convs)
    w1 = jax.random.normal(k1, (3, 3, Cin, Cout), jnp.float32) * (2.0 / (9 * Cin)) ** 0.5
    w2 = jax.random.normal(k2, (3, 3, Cout, Cout), jnp.float32) * (2.0 / (9 * Cout)) ** 0.5
    g1 = 1.0 + 0.1 * jax.random.normal(kg1, (Cout,), jnp.float32)
    b1 = 0.1 * jax.random.normal(kb1, (Cout,), jnp.float32)
    g2 = 1.0 + 0.1 * jax.random.normal(kg2, (Cout,), jnp.float32)
    b2 = 0.1 * jax.random.normal(kb2, (Cout,), jnp.float32)
    params = (w1, g1, b1, w2, g2, b2)

    out = jax.block_until_ready(encoder_block_forward(x, params))
    ref = jax.block_until_ready(reference_forward(x, params))

    assert out.shape == (N, Cout, H // 2, W // 2), out.shape
    # 5e-3 tolerance absorbs rare bf16 near-tie rounding differences between the
    # kernel's and the reference's (identical) mixed-precision conv policy.
    np.testing.assert_allclose(np.asarray(out), np.asarray(ref),
                               rtol=5e-3, atol=5e-3)
    print("KERNEL_OK")
</pallas_src>

<mosaic_0001>
module attributes {stable_mosaic.version = 11 : i64} {
  func.func @encoder_block_kernel(%arg0: memref<2x16x64xf32, #tpu.memory_space<vmem>>, %arg1: memref<3x64x128xbf16, #tpu.memory_space<vmem>>, %arg2: memref<1x128xf32, #tpu.memory_space<vmem>>, %arg3: memref<1x128xf32, #tpu.memory_space<vmem>>, %arg4: memref<3x128x128xbf16, #tpu.memory_space<vmem>>, %arg5: memref<1x128xf32, #tpu.memory_space<vmem>>, %arg6: memref<1x128xf32, #tpu.memory_space<vmem>>, %arg7: memref<32x128xf32, #tpu.memory_space<vmem>>, %arg8: memref<2x18x64xf32, #tpu.memory_space<vmem>>, %arg9: memref<2x18x128xf32, #tpu.memory_space<vmem>>) attributes {dimension_semantics = [], scalar_prefetch = 0 : i64, scratch_operands = 2 : i64, tpu.core_type = #tpu.core_type<tc>} {
    %c0 = arith.constant 0 : index
    %c0_0 = arith.constant 0 : index
    %c0_1 = arith.constant 0 : index
    %0 = vector.load %arg0[%c0, %c0_0, %c0_1] : memref<2x16x64xf32, #tpu.memory_space<vmem>>, vector<2x16x64xf32>
    %cst = arith.constant 0.000000e+00 : f32
    %1 = vector.broadcast %cst : f32 to vector<2x1x64xf32>
    %c0_2 = arith.constant 0 : index
    %c0_3 = arith.constant 0 : index
    %c0_4 = arith.constant 0 : index
    %2 = vector.load %arg8[%c0_2, %c0_3, %c0_4] : memref<2x18x64xf32, #tpu.memory_space<vmem>>, vector<2x1x64xf32>
    tpu.vector_store %arg8[%c0_2, %c0_3, %c0_4], %1 {strides = array<i32>} : memref<2x18x64xf32, #tpu.memory_space<vmem>>, vector<2x1x64xf32>,
    %c0_5 = arith.constant 0 : index
    %c17 = arith.constant 17 : index
    %c0_6 = arith.constant 0 : index
    %3 = vector.load %arg8[%c0_5, %c17, %c0_6] : memref<2x18x64xf32, #tpu.memory_space<vmem>>, vector<2x1x64xf32>
    tpu.vector_store %arg8[%c0_5, %c17, %c0_6], %1 {strides = array<i32>} : memref<2x18x64xf32, #tpu.memory_space<vmem>>, vector<2x1x64xf32>,
    %c0_7 = arith.constant 0 : index
    %c1 = arith.constant 1 : index
    %c0_8 = arith.constant 0 : index
    %4 = vector.load %arg8[%c0_7, %c1, %c0_8] : memref<2x18x64xf32, #tpu.memory_space<vmem>>, vector<2x16x64xf32>
    tpu.vector_store %arg8[%c0_7, %c1, %c0_8], %0 {strides = array<i32>} : memref<2x18x64xf32, #tpu.memory_space<vmem>>, vector<2x16x64xf32>,
    %c0_9 = arith.constant 0 : index
    %c0_10 = arith.constant 0 : index
    %c0_11 = arith.constant 0 : index
    %5 = vector.load %arg8[%c0_9, %c0_10, %c0_11] : memref<2x18x64xf32, #tpu.memory_space<vmem>>, vector<2x16x64xf32>
    %6 = vector.shape_cast %5 : vector<2x16x64xf32> to vector<32x64xf32>
    %7 = arith.truncf %6 : vector<32x64xf32> to vector<32x64xbf16>
    %c0_12 = arith.constant 0 : index
    %c0_13 = arith.constant 0 : index
    %c0_14 = arith.constant 0 : index
    %8 = vector.load %arg1[%c0_12, %c0_13, %c0_14] : memref<3x64x128xbf16, #tpu.memory_space<vmem>>, vector<1x64x128xbf16>
    %9 = vector.shape_cast %8 : vector<1x64x128xbf16> to vector<64x128xbf16>
    %cst_15 = arith.constant dense<0.000000e+00> : vector<32x128xf32>
    %10 = tpu.matmul %7, %9, %cst_15 {dimension_numbers = #tpu.dot_dimension_numbers<[1], [0], [0], [1], [0, 0, 1, 1], [], []>} : vector<32x64xbf16>, vector<64x128xbf16>, vector<32x128xf32> -> vector<32x128xf32>
    %c0_16 = arith.constant 0 : index
    %c1_17 = arith.constant 1 : index
    %c0_18 = arith.constant 0 : index
    %11 = vector.load %arg8[%c0_16, %c1_17, %c0_18] : memref<2x18x64xf32, #tpu.memory_space<vmem>>, vector<2x16x64xf32>
    %12 = vector.shape_cast %11 : vector<2x16x64xf32> to vector<32x64xf32>
    %13 = arith.truncf %12 : vector<32x64xf32> to vector<32x64xbf16>
    %c1_19 = arith.constant 1 : index
    %c0_20 = arith.constant 0 : index
    %c0_21 = arith.constant 0 : index
    %14 = vector.load %arg1[%c1_19, %c0_20, %c0_21] : memref<3x64x128xbf16, #tpu.memory_space<vmem>>, vector<1x64x128xbf16>
    %15 = vector.shape_cast %14 : vector<1x64x128xbf16> to vector<64x128xbf16>
    %cst_22 = arith.constant dense<0.000000e+00> : vector<32x128xf32>
    %16 = tpu.matmul %13, %15, %cst_22 {dimension_numbers = #tpu.dot_dimension_numbers<[1], [0], [0], [1], [0, 0, 1, 1], [], []>} : vector<32x64xbf16>, vector<64x128xbf16>, vector<32x128xf32> -> vector<32x128xf32>
    %17 = arith.addf %10, %16 : vector<32x128xf32>
    %c0_23 = arith.constant 0 : index
    %c2 = arith.constant 2 : index
    %c0_24 = arith.constant 0 : index
    %18 = vector.load %arg8[%c0_23, %c2, %c0_24] : memref<2x18x64xf32, #tpu.memory_space<vmem>>, vector<2x16x64xf32>
    %19 = vector.shape_cast %18 : vector<2x16x64xf32> to vector<32x64xf32>
    %20 = arith.truncf %19 : vector<32x64xf32> to vector<32x64xbf16>
    %c2_25 = arith.constant 2 : index
    %c0_26 = arith.constant 0 : index
    %c0_27 = arith.constant 0 : index
    %21 = vector.load %arg1[%c2_25, %c0_26, %c0_27] : memref<3x64x128xbf16, #tpu.memory_space<vmem>>, vector<1x64x128xbf16>
    %22 = vector.shape_cast %21 : vector<1x64x128xbf16> to vector<64x128xbf16>
    %cst_28 = arith.constant dense<0.000000e+00> : vector<32x128xf32>
    %23 = tpu.matmul %20, %22, %cst_28 {dimension_numbers = #tpu.dot_dimension_numbers<[1], [0], [0], [1], [0, 0, 1, 1], [], []>} : vector<32x64xbf16>, vector<64x128xbf16>, vector<32x128xf32> -> vector<32x128xf32>
    %24 = arith.addf %17, %23 : vector<32x128xf32>
    %c0_29 = arith.constant 0 : index
    %c0_30 = arith.constant 0 : index
    %25 = vector.load %arg2[%c0_29, %c0_30] : memref<1x128xf32, #tpu.memory_space<vmem>>, vector<1x128xf32>
    %c0_31 = arith.constant 0 : index
    %c0_32 = arith.constant 0 : index
    %26 = vector.load %arg3[%c0_31, %c0_32] : memref<1x128xf32, #tpu.memory_space<vmem>>, vector<1x128xf32>
    %cst_33 = arith.constant dense<0.000000e+00> : vector<128xf32>
    %27 = vector.multi_reduction <add>, %24, %cst_33 [0] : vector<32x128xf32> to vector<128xf32>
    %28 = vector.shape_cast %27 : vector<128xf32> to vector<1x128xf32>
    %c8_i32 = arith.constant 8 : i32
    %29 = tpu.dynamic_rotate %28 by %c8_i32 dim 1 : vector<1x128xf32>, i32 -> vector<1x128xf32>
    %30 = arith.addf %28, %29 : vector<1x128xf32>
    %c16_i32 = arith.constant 16 : i32
    %31 = tpu.dynamic_rotate %30 by %c16_i32 dim 1 : vector<1x128xf32>, i32 -> vector<1x128xf32>
    %32 = arith.addf %30, %31 : vector<1x128xf32>
    %c32_i32 = arith.constant 32 : i32
    %33 = tpu.dynamic_rotate %32 by %c32_i32 dim 1 : vector<1x128xf32>, i32 -> vector<1x128xf32>
    %34 = arith.addf %32, %33 : vector<1x128xf32>
    %c64_i32 = arith.constant 64 : i32
    %35 = tpu.dynamic_rotate %34 by %c64_i32 dim 1 : vector<1x128xf32>, i32 -> vector<1x128xf32>
    %36 = arith.addf %34, %35 : vector<1x128xf32>
    %cst_34 = arith.constant 0.001953125 : f32
    %37 = vector.broadcast %cst_34 : f32 to vector<1x128xf32>
    %38 = arith.mulf %36, %37 : vector<1x128xf32>
    %39 = vector.broadcast %38 : vector<1x128xf32> to vector<32x128xf32>
    %40 = arith.subf %24, %39 : vector<32x128xf32>
    %41 = arith.mulf %40, %40 : vector<32x128xf32>
    %cst_35 = arith.constant dense<0.000000e+00> : vector<128xf32>
    %42 = vector.multi_reduction <add>, %41, %cst_35 [0] : vector<32x128xf32> to vector<128xf32>
    %43 = vector.shape_cast %42 : vector<128xf32> to vector<1x128xf32>
    %c8_i32_36 = arith.constant 8 : i32
    %44 = tpu.dynamic_rotate %43 by %c8_i32_36 dim 1 : vector<1x128xf32>, i32 -> vector<1x128xf32>
    %45 = arith.addf %43, %44 : vector<1x128xf32>
    %c16_i32_37 = arith.constant 16 : i32
    %46 = tpu.dynamic_rotate %45 by %c16_i32_37 dim 1 : vector<1x128xf32>, i32 -> vector<1x128xf32>
    %47 = arith.addf %45, %46 : vector<1x128xf32>
    %c32_i32_38 = arith.constant 32 : i32
    %48 = tpu.dynamic_rotate %47 by %c32_i32_38 dim 1 : vector<1x128xf32>, i32 -> vector<1x128xf32>
    %49 = arith.addf %47, %48 : vector<1x128xf32>
    %c64_i32_39 = arith.constant 64 : i32
    %50 = tpu.dynamic_rotate %49 by %c64_i32_39 dim 1 : vector<1x128xf32>, i32 -> vector<1x128xf32>
    %51 = arith.addf %49, %50 : vector<1x128xf32>
    %cst_40 = arith.constant 0.001953125 : f32
    %52 = vector.broadcast %cst_40 : f32 to vector<1x128xf32>
    %53 = arith.mulf %51, %52 : vector<1x128xf32>
    %cst_41 = arith.constant 9.99999974E-6 : f32
    %54 = vector.broadcast %cst_41 : f32 to vector<1x128xf32>
    %55 = arith.addf %53, %54 : vector<1x128xf32>
    %56 = math.rsqrt %55 : vector<1x128xf32>
    %57 = arith.mulf %25, %56 : vector<1x128xf32>
    %58 = vector.broadcast %57 : vector<1x128xf32> to vector<32x128xf32>
    %59 = arith.mulf %40, %58 : vector<32x128xf32>
    %60 = vector.broadcast %26 : vector<1x128xf32> to vector<32x128xf32>
    %61 = arith.addf %59, %60 : vector<32x128xf32>
    %cst_42 = arith.constant 0.000000e+00 : f32
    %62 = vector.broadcast %cst_42 : f32 to vector<32x128xf32>
    %63 = arith.maximumf %61, %62 : vector<32x128xf32>
    %64 = vector.shape_cast %63 : vector<32x128xf32> to vector<2x16x128xf32>
    %cst_43 = arith.constant 0.000000e+00 : f32
    %65 = vector.broadcast %cst_43 : f32 to vector<2x1x128xf32>
    %c0_44 = arith.constant 0 : index
    %c0_45 = arith.constant 0 : index
    %c0_46 = arith.constant 0 : index
    %66 = vector.load %arg9[%c0_44, %c0_45, %c0_46] : memref<2x18x128xf32, #tpu.memory_space<vmem>>, vector<2x1x128xf32>
    tpu.vector_store %arg9[%c0_44, %c0_45, %c0_46], %65 {strides = array<i32>} : memref<2x18x128xf32, #tpu.memory_space<vmem>>, vector<2x1x128xf32>,
    %c0_47 = arith.constant 0 : index
    %c17_48 = arith.constant 17 : index
    %c0_49 = arith.constant 0 : index
    %67 = vector.load %arg9[%c0_47, %c17_48, %c0_49] : memref<2x18x128xf32, #tpu.memory_space<vmem>>, vector<2x1x128xf32>
    tpu.vector_store %arg9[%c0_47, %c17_48, %c0_49], %65 {strides = array<i32>} : memref<2x18x128xf32, #tpu.memory_space<vmem>>, vector<2x1x128xf32>,
    %c0_50 = arith.constant 0 : index
    %c1_51 = arith.constant 1 : index
    %c0_52 = arith.constant 0 : index
    %68 = vector.load %arg9[%c0_50, %c1_51, %c0_52] : memref<2x18x128xf32, #tpu.memory_space<vmem>>, vector<2x16x128xf32>
    tpu.vector_store %arg9[%c0_50, %c1_51, %c0_52], %64 {strides = array<i32>} : memref<2x18x128xf32, #tpu.memory_space<vmem>>, vector<2x16x128xf32>,
    %c0_53 = arith.constant 0 : index
    %c0_54 = arith.constant 0 : index
    %c0_55 = arith.constant 0 : index
    %69 = vector.load %arg9[%c0_53, %c0_54, %c0_55] : memref<2x18x128xf32, #tpu.memory_space<vmem>>, vector<2x16x128xf32>
    %70 = vector.shape_cast %69 : vector<2x16x128xf32> to vector<32x128xf32>
    %71 = arith.truncf %70 : vector<32x128xf32> to vector<32x128xbf16>
    %c0_56 = arith.constant 0 : index
    %c0_57 = arith.constant 0 : index
    %c0_58 = arith.constant 0 : index
    %72 = vector.load %arg4[%c0_56, %c0_57, %c0_58] : memref<3x128x128xbf16, #tpu.memory_space<vmem>>, vector<1x128x128xbf16>
    %73 = vector.shape_cast %72 : vector<1x128x128xbf16> to vector<128x128xbf16>
    %cst_59 = arith.constant dense<0.000000e+00> : vector<32x128xf32>
    %74 = tpu.matmul %71, %73, %cst_59 {dimension_numbers = #tpu.dot_dimension_numbers<[1], [0], [0], [1], [0, 0, 1, 1], [], []>} : vector<32x128xbf16>, vector<128x128xbf16>, vector<32x128xf32> -> vector<32x128xf32>
    %c0_60 = arith.constant 0 : index
    %c1_61 = arith.constant 1 : index
    %c0_62 = arith.constant 0 : index
    %75 = vector.load %arg9[%c0_60, %c1_61, %c0_62] : memref<2x18x128xf32, #tpu.memory_space<vmem>>, vector<2x16x128xf32>
    %76 = vector.shape_cast %75 : vector<2x16x128xf32> to vector<32x128xf32>
    %77 = arith.truncf %76 : vector<32x128xf32> to vector<32x128xbf16>
    %c1_63 = arith.constant 1 : index
    %c0_64 = arith.constant 0 : index
    %c0_65 = arith.constant 0 : index
    %78 = vector.load %arg4[%c1_63, %c0_64, %c0_65] : memref<3x128x128xbf16, #tpu.memory_space<vmem>>, vector<1x128x128xbf16>
    %79 = vector.shape_cast %78 : vector<1x128x128xbf16> to vector<128x128xbf16>
    %cst_66 = arith.constant dense<0.000000e+00> : vector<32x128xf32>
    %80 = tpu.matmul %77, %79, %cst_66 {dimension_numbers = #tpu.dot_dimension_numbers<[1], [0], [0], [1], [0, 0, 1, 1], [], []>} : vector<32x128xbf16>, vector<128x128xbf16>, vector<32x128xf32> -> vector<32x128xf32>
    %81 = arith.addf %74, %80 : vector<32x128xf32>
    %c0_67 = arith.constant 0 : index
    %c2_68 = arith.constant 2 : index
    %c0_69 = arith.constant 0 : index
    %82 = vector.load %arg9[%c0_67, %c2_68, %c0_69] : memref<2x18x128xf32, #tpu.memory_space<vmem>>, vector<2x16x128xf32>
    %83 = vector.shape_cast %82 : vector<2x16x128xf32> to vector<32x128xf32>
    %84 = arith.truncf %83 : vector<32x128xf32> to vector<32x128xbf16>
    %c2_70 = arith.constant 2 : index
    %c0_71 = arith.constant 0 : index
    %c0_72 = arith.constant 0 : index
    %85 = vector.load %arg4[%c2_70, %c0_71, %c0_72] : memref<3x128x128xbf16, #tpu.memory_space<vmem>>, vector<1x128x128xbf16>
    %86 = vector.shape_cast %85 : vector<1x128x128xbf16> to vector<128x128xbf16>
    %cst_73 = arith.constant dense<0.000000e+00> : vector<32x128xf32>
    %87 = tpu.matmul %84, %86, %cst_73 {dimension_numbers = #tpu.dot_dimension_numbers<[1], [0], [0], [1], [0, 0, 1, 1], [], []>} : vector<32x128xbf16>, vector<128x128xbf16>, vector<32x128xf32> -> vector<32x128xf32>
    %88 = arith.addf %81, %87 : vector<32x128xf32>
    %c0_74 = arith.constant 0 : index
    %c0_75 = arith.constant 0 : index
    %89 = vector.load %arg5[%c0_74, %c0_75] : memref<1x128xf32, #tpu.memory_space<vmem>>, vector<1x128xf32>
    %c0_76 = arith.constant 0 : index
    %c0_77 = arith.constant 0 : index
    %90 = vector.load %arg6[%c0_76, %c0_77] : memref<1x128xf32, #tpu.memory_space<vmem>>, vector<1x128xf32>
    %cst_78 = arith.constant dense<0.000000e+00> : vector<128xf32>
    %91 = vector.multi_reduction <add>, %88, %cst_78 [0] : vector<32x128xf32> to vector<128xf32>
    %92 = vector.shape_cast %91 : vector<128xf32> to vector<1x128xf32>
    %c8_i32_79 = arith.constant 8 : i32
    %93 = tpu.dynamic_rotate %92 by %c8_i32_79 dim 1 : vector<1x128xf32>, i32 -> vector<1x128xf32>
    %94 = arith.addf %92, %93 : vector<1x128xf32>
    %c16_i32_80 = arith.constant 16 : i32
    %95 = tpu.dynamic_rotate %94 by %c16_i32_80 dim 1 : vector<1x128xf32>, i32 -> vector<1x128xf32>
    %96 = arith.addf %94, %95 : vector<1x128xf32>
    %c32_i32_81 = arith.constant 32 : i32
    %97 = tpu.dynamic_rotate %96 by %c32_i32_81 dim 1 : vector<1x128xf32>, i32 -> vector<1x128xf32>
    %98 = arith.addf %96, %97 : vector<1x128xf32>
    %c64_i32_82 = arith.constant 64 : i32
    %99 = tpu.dynamic_rotate %98 by %c64_i32_82 dim 1 : vector<1x128xf32>, i32 -> vector<1x128xf32>
    %100 = arith.addf %98, %99 : vector<1x128xf32>
    %cst_83 = arith.constant 0.001953125 : f32
    %101 = vector.broadcast %cst_83 : f32 to vector<1x128xf32>
    %102 = arith.mulf %100, %101 : vector<1x128xf32>
    %103 = vector.broadcast %102 : vector<1x128xf32> to vector<32x128xf32>
    %104 = arith.subf %88, %103 : vector<32x128xf32>
    %105 = arith.mulf %104, %104 : vector<32x128xf32>
    %cst_84 = arith.constant dense<0.000000e+00> : vector<128xf32>
    %106 = vector.multi_reduction <add>, %105, %cst_84 [0] : vector<32x128xf32> to vector<128xf32>
    %107 = vector.shape_cast %106 : vector<128xf32> to vector<1x128xf32>
    %c8_i32_85 = arith.constant 8 : i32
    %108 = tpu.dynamic_rotate %107 by %c8_i32_85 dim 1 : vector<1x128xf32>, i32 -> vector<1x128xf32>
    %109 = arith.addf %107, %108 : vector<1x128xf32>
    %c16_i32_86 = arith.constant 16 : i32
    %110 = tpu.dynamic_rotate %109 by %c16_i32_86 dim 1 : vector<1x128xf32>, i32 -> vector<1x128xf32>
    %111 = arith.addf %109, %110 : vector<1x128xf32>
    %c32_i32_87 = arith.constant 32 : i32
    %112 = tpu.dynamic_rotate %111 by %c32_i32_87 dim 1 : vector<1x128xf32>, i32 -> vector<1x128xf32>
    %113 = arith.addf %111, %112 : vector<1x128xf32>
    %c64_i32_88 = arith.constant 64 : i32
    %114 = tpu.dynamic_rotate %113 by %c64_i32_88 dim 1 : vector<1x128xf32>, i32 -> vector<1x128xf32>
    %115 = arith.addf %113, %114 : vector<1x128xf32>
    %cst_89 = arith.constant 0.001953125 : f32
    %116 = vector.broadcast %cst_89 : f32 to vector<1x128xf32>
    %117 = arith.mulf %115, %116 : vector<1x128xf32>
    %cst_90 = arith.constant 9.99999974E-6 : f32
    %118 = vector.broadcast %cst_90 : f32 to vector<1x128xf32>
    %119 = arith.addf %117, %118 : vector<1x128xf32>
    %120 = math.rsqrt %119 : vector<1x128xf32>
    %121 = arith.mulf %89, %120 : vector<1x128xf32>
    %122 = vector.broadcast %121 : vector<1x128xf32> to vector<32x128xf32>
    %123 = arith.mulf %104, %122 : vector<32x128xf32>
    %124 = vector.broadcast %90 : vector<1x128xf32> to vector<32x128xf32>
    %125 = arith.addf %123, %124 : vector<32x128xf32>
    %cst_91 = arith.constant 0.000000e+00 : f32
    %126 = vector.broadcast %cst_91 : f32 to vector<32x128xf32>
    %127 = arith.maximumf %125, %126 : vector<32x128xf32>
    %128 = vector.extract_strided_slice %127 {offsets = [0, 8], sizes = [32, 120], strides = [1, 1]} : vector<32x128xf32> to vector<32x120xf32>
    %129 = vector.extract_strided_slice %127 {offsets = [0, 0], sizes = [32, 8], strides = [1, 1]} : vector<32x128xf32> to vector<32x8xf32>
    %130 = tpu.concatenate %128, %129 in 1 : vector<32x120xf32>, vector<32x8xf32> -> vector<32x128xf32>
    %131 = arith.maximumf %127, %130 : vector<32x128xf32>
    %132 = vector.extract_strided_slice %131 {offsets = [1, 0], sizes = [31, 128], strides = [1, 1]} : vector<32x128xf32> to vector<31x128xf32>
    %133 = vector.extract_strided_slice %131 {offsets = [0, 0], sizes = [1, 128], strides = [1, 1]} : vector<32x128xf32> to vector<1x128xf32>
    %134 = tpu.concatenate %132, %133 in 0 : vector<31x128xf32>, vector<1x128xf32> -> vector<32x128xf32>
    %135 = arith.maximumf %131, %134 : vector<32x128xf32>
    %c0_92 = arith.constant 0 : index
    %c0_93 = arith.constant 0 : index
    %136 = vector.load %arg7[%c0_92, %c0_93] : memref<32x128xf32, #tpu.memory_space<vmem>>, vector<32x128xf32>
    tpu.vector_store %arg7[%c0_92, %c0_93], %135 {strides = array<i32>} : memref<32x128xf32, #tpu.memory_space<vmem>>, vector<32x128xf32>,
    return
  }
}

</mosaic_0001>

<bundles_post_ra>
// kernel: encoder_block_forward.1
= control target key start
LH: loop header
LB: loop body
LE: loop exit
PB: predicated region body
PF: predicated region fallthrough
CT: control target
= control target key end

     0   :  { %vm31_vm0 = vcmask 516096   ;;  %v1215_v1 = vmov 0.0   ;;  %vm36_vm1 = vcmask 523264   ;;  %s1217_s9 = smov 16   ;;  %s1218_s10 = smov 32   ;;  %v350_v54 = vlaneseq  ;;  %s1457_s1 = inlined_call_operand.vmem [shape: bf16[3,64,128], index: 1, kind: input, shape index: {}]   ;;  %s1458_s0 = inlined_call_operand.vmem [shape: f32[2,16,64], index: 0, kind: input, shape index: {}]   ;;  %s1459_s4 = inlined_call_operand.vmem [shape: bf16[3,128,128], index: 4, kind: input, shape index: {}]   ;;  %s1460_s2 = inlined_call_operand.vmem [shape: f32[1,128], index: 2, kind: input, shape index: {}]   ;;  %s1461_s3 = inlined_call_operand.vmem [shape: f32[1,128], index: 3, kind: input, shape index: {}]   ;;  %s1462_s5 = inlined_call_operand.vmem [shape: f32[1,128], index: 5, kind: input, shape index: {}]   ;;  %s1463_s6 = inlined_call_operand.vmem [shape: f32[1,128], index: 6, kind: input, shape index: {}]   ;;  %s1464_s7 = inlined_call_operand.vmem [shape: f32[32,128], index: 7, kind: output, shape index: {}]  }
   0x1   :  { %v1175_v0 = vld [vmem:[%s1457_s1 + $0x20] sm:$0xff]   ;;  %32 = vst.msk [vmem:[#allocation2] sm:$0x1] %vm31_vm0, %v1215_v1  ;;  %33 = vst.msk [vmem:[#allocation2 + $0x18] sm:$0x1] %vm31_vm0, %v1215_v1  ;;  %v1176_v2 = vld [vmem:[%s1457_s1 + $0x28] sm:$0xff]  }
   0x2   :  { %34 = vst.msk [vmem:[#allocation2 + $0x11] sm:$0x1] %vm31_vm0, %v1215_v1  ;;  %35 = vst.msk [vmem:[#allocation2 + $0x29] sm:$0x1] %vm31_vm0, %v1215_v1  ;;  %1057 = vmatprep.subr.bf16.mxu0 %v1175_v0  ;;  %v1177_v3 = vld [vmem:[%s1457_s1 + $0x30] sm:$0xff]   ;;  %v27_v4 = vld [vmem:[%s1458_s0] sm:$0xff] }
   0x3   :  { %411 = vst [vmem:[#allocation3] sm:$0x1] %v1215_v1  ;;  %412 = vst [vmem:[#allocation3 + $0x18] sm:$0x1] %v1215_v1  ;;  %1058 = vmatpush3.bf16.msra.mxu0 %v1175_v0  ;;  %v28_v5 = vld [vmem:[%s1458_s0 + $0x8] sm:$0xff]  ;;  %v29_v6 = vld [vmem:[%s1458_s0 + $0x10] sm:$0xff] }
   0x4   :  { %413 = vst [vmem:[#allocation3 + $0x11] sm:$0x1] %v1215_v1  ;;  %414 = vst [vmem:[#allocation3 + $0x29] sm:$0x1] %v1215_v1  ;;  %1059 = vmatprep.subr.bf16.mxu0 %v1176_v2  ;;  %v30_v7 = vld [vmem:[%s1458_s0 + $0x18] sm:$0xff]  ;;  %v1179_v9 = vld [vmem:[%s1457_s1] sm:$0xff]  }
   0x5   :  { %37 = vst.msk [vmem:[#allocation2 + $0x1] sm:$0xff] %vm36_vm1, %v27_v4  ;;  %38 = vst.msk [vmem:[#allocation2 + $0x9] sm:$0xff] %vm36_vm1, %v28_v5  ;;  %v1178_v8 = vld [vmem:[%s1457_s1 + $0x38] sm:$0xff]   ;;  %v1180_v19 = vld [vmem:[%s1457_s1 + $0x8] sm:$0xff]   ;;  %s1219_s11 = smov 64   ;;  %v351_v55 = vshrl.u32 %v350_v54, 7 }
   0x6   :  { %39 = vst.msk [vmem:[#allocation2 + $0x19] sm:$0xff] %vm36_vm1, %v29_v6  ;;  %40 = vst.msk [vmem:[#allocation2 + $0x21] sm:$0xff] %vm36_vm1, %v30_v7  ;;  %v1181_v20 = vld [vmem:[%s1457_s1 + $0x10] sm:$0xff]   ;;  %v1182_v21 = vld [vmem:[%s1457_s1 + $0x18] sm:$0xff]   ;;  %vm891_vm2 = vcmask 1046528  }
   0x7   :  { %1060 = vmatpush3.bf16.msra.mxu0 %v1176_v2  ;;  %v1183_v24 = vld [vmem:[%s1457_s1 + $0x40] sm:$0xff]   ;;  %v1184_v29 = vld [vmem:[%s1457_s1 + $0x48] sm:$0xff]   ;;  %v1185_v30 = vld [vmem:[%s1457_s1 + $0x50] sm:$0xff]   ;;  %v1323_v57 = vsub.s32 0, %v351_v55 }
   0x8   :  { %1061 = vmatprep.subr.bf16.mxu0 %v1177_v3  ;;  %v1186_v31 = vld [vmem:[%s1457_s1 + $0x58] sm:$0xff]   ;;  %s1216_s1 = smov 8  }
   0xb   :  { %1062 = vmatpush3.bf16.msra.mxu0 %v1177_v3 }
   0xc   :  { %1063 = vmatprep.subr.bf16.mxu0 %v1178_v8  ;;  %v55_v10 = vld [vmem:[#allocation2 + $0x1] sm:$0xff]  ;;  %v56_v11 = vld [vmem:[#allocation2 + $0x9] sm:$0xff] }
   0xd   :  { %v41_v12 = vld [vmem:[#allocation2] sm:$0xff]  ;;  %v59_v13 = vpack.c.bf16 %v56_v11, %v55_v10  ;;  %v42_v15 = vld [vmem:[#allocation2 + $0x8] sm:$0xff]  ;;  %v43_v22 = vld [vmem:[#allocation2 + $0x18] sm:$0xff] }
   0xe   :  { %v57_v14 = vld [vmem:[#allocation2 + $0x19] sm:$0xff]  ;;  %v58_v16 = vld [vmem:[#allocation2 + $0x21] sm:$0xff]  ;;  %v45_v18 = vpack.c.bf16 %v42_v15, %v41_v12  ;;  %v229_v26 = vld [vmem:[#allocation2 + $0xa] sm:$0xff] }
   0xf   :  { %1064 = vmatpush3.bf16.msra.mxu0 %v1178_v8  ;;  %1065 = vmatprep.mubr.msk.bf16.mxu0 %vm36_vm1, %v59_v13  ;;  %v60_v17 = vpack.c.bf16 %v58_v16, %v57_v14  ;;  %v44_v23 = vld [vmem:[#allocation2 + $0x20] sm:$0xff] }
  0x10   :  { %1069 = vmatprep.subr.bf16.mxu0 %v1179_v9  ;;  %v228_v25 = vld [vmem:[#allocation2 + $0x2] sm:$0xff]  ;;  %v46_v27 = vpack.c.bf16 %v44_v23, %v43_v22  ;;  %v230_v32 = vld [vmem:[#allocation2 + $0x1a] sm:$0xff] }
  0x11   :  { %v232_v28 = vpack.c.bf16 %v229_v26, %v228_v25  ;;  %v231_v33 = vld [vmem:[#allocation2 + $0x22] sm:$0xff]  ;;  %v1194_v23 = vld [vmem:[%s1459_s4 + $0x58] sm:$0xff]   ;;  %v1191_v26 = vld [vmem:[%s1459_s4 + $0x10] sm:$0xff]  }
  0x12   :  { %1066 = vmatmul.mubr.msk.bf16.vlgmr.msra.gmra.mrb[0].mxu0 %vm36_vm1, %v60_v17  ;;  %v233_v34 = vpack.c.bf16 %v231_v33, %v230_v32  ;;  %v1189_v22 = vld [vmem:[%s1459_s4 + $0x8] sm:$0xff]   ;;  %v1202_v33 = vld [vmem:[%s1459_s4 + $0x78] sm:$0xff]  }
  0x13   :  { %1070 = vmatpush3.bf16.msra.mxu0 %v1179_v9  ;;  %1077 = vmatprep.mubr.msk.bf16.mxu0 %vm36_vm1, %v45_v18  ;;  %v1188_v18 = vld [vmem:[%s1459_s4 + $0x40] sm:$0xff]   ;;  %v1197_v32 = vld [vmem:[%s1459_s4 + $0x28] sm:$0xff]  }
  0x14   :  { %1071 = vmatprep.subr.bf16.mxu0 %v1180_v19 }
  0x17   :  { %1072 = vmatpush3.bf16.msra.mxu0 %v1180_v19  ;;  %v1190_v19 = vld [vmem:[%s1459_s4 + $0x48] sm:$0xff]  }
  0x18   :  { %1073 = vmatprep.subr.bf16.mxu0 %v1181_v20 }
  0x1b   :  { %1074 = vmatpush3.bf16.msra.mxu0 %v1181_v20  ;;  %v1187_v20 = vld [vmem:[%s1459_s4] sm:$0xff]  }
  0x1c   :  { %1075 = vmatprep.subr.bf16.mxu0 %v1182_v21  ;;  %1113 = vmatprep.subr.bf16.mxu1 %v1187_v20 }
  0x1d   :  { %1114 = vmatpush3.bf16.msra.mxu1 %v1187_v20 }
  0x1e   :  { %1115 = vmatprep.subr.bf16.mxu1 %v1189_v22 }
  0x1f   :  { %1076 = vmatpush3.bf16.msra.mxu0 %v1182_v21  ;;  %v1192_v21 = vld [vmem:[%s1459_s4 + $0x50] sm:$0xff]  }
  0x20   :  { %1081 = vmatprep.subr.bf16.mxu0 %v1183_v24 }
  0x21   :  { %1116 = vmatpush3.bf16.msra.mxu1 %v1189_v22 }
  0x22   :  { %1078 = vmatmul.mubr.msk.bf16.vlgmr.msra.gmra.mrb[0].mxu0 %vm36_vm1, %v46_v27  ;;  %v1196_v27 = vld [vmem:[%s1459_s4 + $0x60] sm:$0xff]   ;;  %1117 = vmatprep.subr.bf16.mxu1 %v1191_v26 }
  0x23   :  { %1082 = vmatpush3.bf16.msra.mxu0 %v1183_v24  ;;  %1089 = vmatprep.mubr.msk.bf16.mxu0 %vm36_vm1, %v232_v28  ;;  %v1193_v28 = vld [vmem:[%s1459_s4 + $0x18] sm:$0xff]  }
  0x24   :  { %1083 = vmatprep.subr.bf16.mxu0 %v1184_v29 }
  0x25   :  { %1118 = vmatpush3.bf16.msra.mxu1 %v1191_v26 }
  0x26   :  { %1119 = vmatprep.subr.bf16.mxu1 %v1193_v28 }
  0x27   :  { %1084 = vmatpush3.bf16.msra.mxu0 %v1184_v29  ;;  %v1198_v29 = vld [vmem:[%s1459_s4 + $0x68] sm:$0xff]  }
  0x28   :  { %1085 = vmatprep.subr.bf16.mxu0 %v1185_v30 }
  0x29   :  { %1120 = vmatpush3.bf16.msra.mxu1 %v1193_v28 }
  0x2b   :  { %1086 = vmatpush3.bf16.msra.mxu0 %v1185_v30  ;;  %v1195_v30 = vld [vmem:[%s1459_s4 + $0x20] sm:$0xff]  }
  0x2c   :  { %1087 = vmatprep.subr.bf16.mxu0 %v1186_v31  ;;  %1121 = vmatprep.subr.bf16.mxu1 %v1195_v30 }
  0x2d   :  { %1122 = vmatpush3.bf16.msra.mxu1 %v1195_v30 }
  0x2e   :  { %1123 = vmatprep.subr.bf16.mxu1 %v1197_v32 }
  0x2f   :  { %1088 = vmatpush3.bf16.msra.mxu0 %v1186_v31  ;;  %v1200_v31 = vld [vmem:[%s1459_s4 + $0x70] sm:$0xff]  }
  0x30   :  { %1093 = vmatprep.subr.bf16.mxu0 %v1188_v18 }
  0x31   :  { %1124 = vmatpush3.bf16.msra.mxu1 %v1197_v32 }
  0x32   :  { %1090 = vmatmul.mubr.msk.bf16.vlgmr.msra.gmra.mrb[0].mxu0 %vm36_vm1, %v233_v34  ;;  %v1199_v34 = vld [vmem:[%s1459_s4 + $0x30] sm:$0xff]  }
  0x33   :  { %1094 = vmatpush3.bf16.msra.mxu0 %v1188_v18  ;;  %1125 = vmatprep.subr.bf16.mxu1 %v1199_v34 }
  0x34   :  { %1095 = vmatprep.subr.bf16.mxu0 %v1190_v19 }
  0x35   :  { %1126 = vmatpush3.bf16.msra.mxu1 %v1199_v34 }
  0x37   :  { %1096 = vmatpush3.bf16.msra.mxu0 %v1190_v19 }
  0x38   :  { %1097 = vmatprep.subr.bf16.mxu0 %v1192_v21 }
  0x3b   :  { %1098 = vmatpush3.bf16.msra.mxu0 %v1192_v21 }
  0x3c   :  { %1099 = vmatprep.subr.bf16.mxu0 %v1194_v23 }
  0x3f   :  { %1100 = vmatpush3.bf16.msra.mxu0 %v1194_v23 }
  0x40   :  { %1101 = vmatprep.subr.bf16.mxu0 %v1196_v27 }
  0x43   :  { %1102 = vmatpush3.bf16.msra.mxu0 %v1196_v27 }
  0x44   :  { %1103 = vmatprep.subr.bf16.mxu0 %v1198_v29 }
  0x47   :  { %1104 = vmatpush3.bf16.msra.mxu0 %v1198_v29 }
  0x48   :  { %1105 = vmatprep.subr.bf16.mxu0 %v1200_v31 }
  0x4b   :  { %1106 = vmatpush3.bf16.msra.mxu0 %v1200_v31 }
  0x4c   :  { %1107 = vmatprep.subr.bf16.mxu0 %v1202_v33 }
  0x4f   :  { %1108 = vmatpush3.bf16.msra.mxu0 %v1202_v33 }
 0x105   :  { %v1091_v35 = vpop.f32.mrb[0].mxu0 }
 0x106   :  { %v307_v36 = vpop.f32.mrb[1].mxu0 }
 0x107   :  { %v1092_v37 = vpop.f32.mrb[2].mxu0 }
 0x108   :  { %v310_v38 = vpop.f32.mrb[3].mxu0 }
 0x109   :  { %v328_v39 = vadd.f32 %v310_v38, %v307_v36 }
 0x10b   :  { %v329_v40 = vadd.f32 %v1091_v35, %v328_v39 }
 0x10d   :  { %v330_v41 = vadd.f32 %v1092_v37, %v329_v40 }
 0x10f   :  { %v331_v42 = vrot.slane %v330_v41, 4 }
 0x111   :  { %v332_v43 = vadd.f32 %v331_v42, %v330_v41  ;;  %v326_v41 = vld [vmem:[%s1460_s2] sm:$0x1] }
 0x113   :  { %v333_v44 = vrot.slane %v332_v43, 2 }
 0x115   :  { %v334_v45 = vadd.f32 %v333_v44, %v332_v43 }
 0x117   :  { %v335_v46 = vrot.slane %v334_v45, 1 }
 0x119   :  { %v336_v47 = vadd.f32 %v335_v46, %v334_v45  ;;  %v951_v45 = vld [vmem:[%s1461_s3] ss:$0 sm:$0xff] }
 0x11b   :  { %337 = vrot.lane.b32.xlu0 %v336_v47, %s1216_s1 }
 0x18d   :  { %v338_v48 = vpop.permute.xlu0 %337 }
 0x18e   :  { %v339_v49 = vadd.f32 %v338_v48, %v336_v47 }
 0x190   :  { %340 = vrot.lane.b32.xlu0 %v339_v49, %s1217_s9 }
 0x202   :  { %v341_v50 = vpop.permute.xlu0 %340 }
 0x203   :  { %v342_v51 = vadd.f32 %v341_v50, %v339_v49 }
 0x205   :  { %343 = vrot.lane.b32.xlu1 %v342_v51, %s1218_s10 }
 0x277   :  { %v344_v52 = vpop.permute.xlu1 %343 }
 0x278   :  { %v345_v53 = vadd.f32 %v344_v52, %v342_v51 }
 0x27a   :  { %346 = vrot.lane.b32.xlu1 %v345_v53, %s1219_s11 }
 0x2ec   :  { %v347_v56 = vpop.permute.xlu1 %346 }
 0x2ed   :  { %v348_v58 = vadd.f32 %v347_v56, %v345_v53 }
 0x2ef   :  { %v349_v59 = vmul.f32 0.001953125, %v348_v58 }
 0x2f1   :  { %v353_v60 = vrot.slane %v349_v59, %v1323_v57 }
 0x2f3   :  { %v1326_v61 = vsub.f32 %v307_v36, %v353_v60  ;;  %v1328_v62 = vsub.f32 %v310_v38, %v353_v60  ;;  %v1330_v63 = vsub.f32 %v1091_v35, %v353_v60  ;;  %v1332_v0 = vsub.f32 %v1092_v37, %v353_v60  ;;  %v1201_v35 = vld [vmem:[%s1459_s4 + $0x38] sm:$0xff]   ;;  %v1203_v36 = vld [vmem:[%s1459_s4 + $0x80] sm:$0xff]  }
 0x2f4   :  { %1127 = vmatprep.subr.bf16.mxu1 %v1201_v35 }
 0x2f5   :  { %v358_v1 = vmul.f32 %v1326_v61, %v1326_v61  ;;  %v359_v2 = vmul.f32 %v1328_v62, %v1328_v62  ;;  %v360_v3 = vmul.f32 %v1330_v63, %v1330_v63  ;;  %v361_v5 = vmul.f32 %v1332_v0, %v1332_v0  ;;  %1128 = vmatpush3.bf16.msra.mxu1 %v1201_v35 }
 0x2f6   :  { %1133 = vmatprep.subr.bf16.mxu1 %v1203_v36 }
 0x2f7   :  { %v362_v4 = vadd.f32 %v359_v2, %v358_v1 }
 0x2f9   :  { %v363_v6 = vadd.f32 %v362_v4, %v360_v3 }
 0x2fb   :  { %v364_v7 = vadd.f32 %v363_v6, %v361_v5  ;;  %v1204_v5 = vld [vmem:[%s1459_s4 + $0x88] sm:$0xff]  }
 0x2fd   :  { %v365_v8 = vrot.slane %v364_v7, 4 }
 0x2ff   :  { %v366_v9 = vadd.f32 %v365_v8, %v364_v7  ;;  %v1205_v7 = vld [vmem:[%s1459_s4 + $0x90] sm:$0xff]   ;;  %v1206_v8 = vld [vmem:[%s1459_s4 + $0x98] sm:$0xff]  }
 0x301   :  { %v367_v10 = vrot.slane %v366_v9, 2 }
 0x303   :  { %v368_v11 = vadd.f32 %v367_v10, %v366_v9  ;;  %v1207_v9 = vld [vmem:[%s1459_s4 + $0xa0] sm:$0xff]   ;;  %v1208_v10 = vld [vmem:[%s1459_s4 + $0xa8] sm:$0xff]  }
 0x305   :  { %v369_v12 = vrot.slane %v368_v11, 1 }
 0x307   :  { %v370_v13 = vadd.f32 %v369_v12, %v368_v11  ;;  %v1209_v11 = vld [vmem:[%s1459_s4 + $0xb0] sm:$0xff]   ;;  %v1210_v12 = vld [vmem:[%s1459_s4 + $0xb8] sm:$0xff]  }
 0x309   :  { %371 = vrot.lane.b32.xlu0 %v370_v13, %s1216_s1 }
 0x37b   :  { %v372_v14 = vpop.permute.xlu0 %371 }
 0x37c   :  { %v373_v15 = vadd.f32 %v372_v14, %v370_v13 }
 0x37e   :  { %374 = vrot.lane.b32.xlu1 %v373_v15, %s1217_s9 }
 0x3f0   :  { %v375_v16 = vpop.permute.xlu1 %374 }
 0x3f1   :  { %v376_v17 = vadd.f32 %v375_v16, %v373_v15 }
 0x3f3   :  { %377 = vrot.lane.b32.xlu0 %v376_v17, %s1218_s10 }
 0x465   :  { %v378_v24 = vpop.permute.xlu0 %377 }
 0x466   :  { %v379_v25 = vadd.f32 %v378_v24, %v376_v17 }
 0x468   :  { %380 = vrot.lane.b32.xlu1 %v379_v25, %s1219_s11 }
 0x4da   :  { %v381_v37 = vpop.permute.xlu1 %380 }
 0x4db   :  { %v382_v38 = vadd.f32 %v381_v37, %v379_v25 }
 0x4dd   :  { %v383_v39 = vmul.f32 0.001953125, %v382_v38 }
 0x4df   :  { %v384_v40 = vadd.f32 1e-05, %v383_v39 }
 0x4e1   :  { %1211 = vrsqrt.f32 %v384_v40 }
 0x4eb   :  { %v1212_v42 = vpop.eup %1211 }
 0x4ec   :  { %v386_v43 = vmul.f32 %v1212_v42, %v326_v41 }
 0x4ee   :  { %v391_v44 = vrot.slane %v386_v43, %v1323_v57 }
 0x4f0   :  { %v393_v46 = vmul.f32 %v391_v44, %v1326_v61  ;;  %v394_v47 = vmul.f32 %v391_v44, %v1328_v62  ;;  %v395_v48 = vmul.f32 %v391_v44, %v1330_v63  ;;  %v396_v49 = vmul.f32 %v391_v44, %v1332_v0 }
 0x4f2   :  { %v403_v50 = vadd.f32 %v951_v45, %v393_v46  ;;  %v404_v51 = vadd.f32 %v951_v45, %v394_v47  ;;  %v405_v52 = vadd.f32 %v951_v45, %v395_v48  ;;  %v406_v53 = vadd.f32 %v951_v45, %v396_v49 }
 0x4f4   :  { %v407_v54 = vmax.f32 %v403_v50, 0.0  ;;  %v408_v55 = vmax.f32 %v404_v51, 0.0  ;;  %v409_v56 = vmax.f32 %v405_v52, 0.0  ;;  %v410_v58 = vmax.f32 %v406_v53, 0.0 }
 0x4f6   :  { %415 = vst [vmem:[#allocation3 + $0x1] sm:$0xff] %v407_v54  ;;  %416 = vst [vmem:[#allocation3 + $0x9] sm:$0xff] %v408_v55  ;;  %v445_v59 = vpack.c.bf16 %v408_v55, %v407_v54  ;;  %v446_v60 = vpack.c.bf16 %v410_v58, %v409_v56 }
 0x4f7   :  { %417 = vst [vmem:[#allocation3 + $0x19] sm:$0xff] %v409_v56  ;;  %418 = vst [vmem:[#allocation3 + $0x21] sm:$0xff] %v410_v58 }
 0x4f8   :  { %1109 = vmatprep.mubr.bf16.mxu0 %v445_v59 }
 0x4f9   :  { %1110 = vmatmul.mubr.bf16.vlgmr.msra.gmra.mrb[4].mxu0 %v446_v60 }
 0x4fd   :  { %v419_v61 = vld [vmem:[#allocation3] sm:$0xff]  ;;  %v420_v62 = vld [vmem:[#allocation3 + $0x8] sm:$0xff] }
 0x4fe   :  { %v421_v63 = vld [vmem:[#allocation3 + $0x18] sm:$0xff]  ;;  %v423_v0 = vpack.c.bf16 %v420_v62, %v419_v61  ;;  %v422_v1 = vld [vmem:[#allocation3 + $0x20] sm:$0xff]  ;;  %v659_v3 = vld [vmem:[#allocation3 + $0xa] sm:$0xff] }
 0x4ff   :  { %v658_v2 = vld [vmem:[#allocation3 + $0x2] sm:$0xff]  ;;  %v424_v4 = vpack.c.bf16 %v422_v1, %v421_v63  ;;  %v660_v13 = vld [vmem:[#allocation3 + $0x1a] sm:$0xff] }
 0x500   :  { %1129 = vmatprep.mubr.bf16.mxu1 %v423_v0  ;;  %v662_v6 = vpack.c.bf16 %v659_v3, %v658_v2  ;;  %v661_v14 = vld [vmem:[#allocation3 + $0x22] sm:$0xff] }
 0x501   :  { %1130 = vmatmul.mubr.bf16.vlgmr.msra.gmra.mrb[0].mxu1 %v424_v4  ;;  %v663_v15 = vpack.c.bf16 %v661_v14, %v660_v13 }
 0x502   :  { %1134 = vmatpush3.bf16.msra.mxu1 %v1203_v36  ;;  %1149 = vmatprep.mubr.bf16.mxu1 %v662_v6 }
 0x503   :  { %1135 = vmatprep.subr.bf16.mxu1 %v1204_v5 }
 0x506   :  { %1136 = vmatpush3.bf16.msra.mxu1 %v1204_v5 }
 0x507   :  { %1137 = vmatprep.subr.bf16.mxu1 %v1205_v7 }
 0x50a   :  { %1138 = vmatpush3.bf16.msra.mxu1 %v1205_v7 }
 0x50b   :  { %1139 = vmatprep.subr.bf16.mxu1 %v1206_v8 }
 0x50e   :  { %1140 = vmatpush3.bf16.msra.mxu1 %v1206_v8 }
 0x50f   :  { %1141 = vmatprep.subr.bf16.mxu1 %v1207_v9 }
 0x512   :  { %1142 = vmatpush3.bf16.msra.mxu1 %v1207_v9 }
 0x513   :  { %1143 = vmatprep.subr.bf16.mxu1 %v1208_v10 }
 0x516   :  { %1144 = vmatpush3.bf16.msra.mxu1 %v1208_v10 }
 0x517   :  { %1145 = vmatprep.subr.bf16.mxu1 %v1209_v11 }
 0x51a   :  { %1146 = vmatpush3.bf16.msra.mxu1 %v1209_v11  ;;  %v782_v11 = vld [vmem:[%s1462_s5] sm:$0x1] }
 0x51b   :  { %1147 = vmatprep.subr.bf16.mxu1 %v1210_v12 }
 0x51e   :  { %1148 = vmatpush3.bf16.msra.mxu1 %v1210_v12 }
 0x521   :  { %1150 = vmatmul.mubr.bf16.vlgmr.msra.gmra.mrb[0].mxu1 %v663_v15  ;;  %v1008_v15 = vld [vmem:[%s1463_s6] ss:$0 sm:$0xff] }
 0x5cc   :  { %v1111_v16 = vpop.f32.mrb[4].mxu0 }
 0x5cd   :  { %v546_v17 = vpop.f32.mrb[5].mxu0 }
 0x5ce   :  { %v1112_v18 = vpop.f32.mrb[6].mxu0 }
 0x5cf   :  { %v549_v19 = vpop.f32.mrb[7].mxu0 }
 0x5f4   :  { %v1151_v20 = vpop.f32.mrb[0].mxu1 }
 0x5f5   :  { %v1153_v21 = vadd.f32 %v1151_v20, %v1111_v16  ;;  %v763_v22 = vpop.f32.mrb[1].mxu1 }
 0x5f6   :  { %v1154_v23 = vadd.f32 %v763_v22, %v546_v17  ;;  %v1152_v24 = vpop.f32.mrb[2].mxu1 }
 0x5f7   :  { %v1155_v25 = vadd.f32 %v1152_v24, %v1112_v18  ;;  %v766_v26 = vpop.f32.mrb[3].mxu1 }
 0x5f8   :  { %v1156_v27 = vadd.f32 %v766_v26, %v549_v19 }
 0x5fa   :  { %v784_v28 = vadd.f32 %v1156_v27, %v1154_v23 }
 0x5fc   :  { %v785_v29 = vadd.f32 %v1153_v21, %v784_v28 }
 0x5fe   :  { %v786_v30 = vadd.f32 %v1155_v25, %v785_v29 }
 0x600   :  { %v787_v31 = vrot.slane %v786_v30, 4 }
 0x602   :  { %v788_v32 = vadd.f32 %v787_v31, %v786_v30 }
 0x604   :  { %v789_v33 = vrot.slane %v788_v32, 2 }
 0x606   :  { %v790_v34 = vadd.f32 %v789_v33, %v788_v32 }
 0x608   :  { %v791_v35 = vrot.slane %v790_v34, 1 }
 0x60a   :  { %v792_v36 = vadd.f32 %v791_v35, %v790_v34 }
 0x60c   :  { %793 = vrot.lane.b32.xlu0 %v792_v36, %s1216_s1 }
 0x67e   :  { %v794_v37 = vpop.permute.xlu0 %793 }
 0x67f   :  { %v795_v38 = vadd.f32 %v794_v37, %v792_v36 }
 0x681   :  { %796 = vrot.lane.b32.xlu1 %v795_v38, %s1217_s9 }
 0x6f3   :  { %v797_v39 = vpop.permute.xlu1 %796 }
 0x6f4   :  { %v798_v40 = vadd.f32 %v797_v39, %v795_v38 }
 0x6f6   :  { %799 = vrot.lane.b32.xlu0 %v798_v40, %s1218_s10 }
 0x768   :  { %v800_v41 = vpop.permute.xlu0 %799 }
 0x769   :  { %v801_v42 = vadd.f32 %v800_v41, %v798_v40 }
 0x76b   :  { %802 = vrot.lane.b32.xlu1 %v801_v42, %s1219_s11 }
 0x7dd   :  { %v803_v43 = vpop.permute.xlu1 %802 }
 0x7de   :  { %v804_v44 = vadd.f32 %v803_v43, %v801_v42 }
 0x7e0   :  { %v805_v45 = vmul.f32 0.001953125, %v804_v44 }
 0x7e2   :  { %v809_v46 = vrot.slane %v805_v45, %v1323_v57 }
 0x7e4   :  { %v810_v47 = vsub.f32 %v1154_v23, %v809_v46  ;;  %v811_v48 = vsub.f32 %v1156_v27, %v809_v46  ;;  %v812_v49 = vsub.f32 %v1153_v21, %v809_v46  ;;  %v813_v50 = vsub.f32 %v1155_v25, %v809_v46 }
 0x7e6   :  { %v814_v51 = vmul.f32 %v810_v47, %v810_v47  ;;  %v815_v52 = vmul.f32 %v811_v48, %v811_v48  ;;  %v816_v53 = vmul.f32 %v812_v49, %v812_v49  ;;  %v817_v55 = vmul.f32 %v813_v50, %v813_v50 }
 0x7e8   :  { %v818_v54 = vadd.f32 %v815_v52, %v814_v51 }
 0x7ea   :  { %v819_v56 = vadd.f32 %v818_v54, %v816_v53 }
 0x7ec   :  { %v820_v58 = vadd.f32 %v819_v56, %v817_v55 }
 0x7ee   :  { %v821_v59 = vrot.slane %v820_v58, 4 }
 0x7f0   :  { %v822_v60 = vadd.f32 %v821_v59, %v820_v58 }
 0x7f2   :  { %v823_v61 = vrot.slane %v822_v60, 2 }
 0x7f4   :  { %v824_v62 = vadd.f32 %v823_v61, %v822_v60 }
 0x7f6   :  { %v825_v63 = vrot.slane %v824_v62, 1 }
 0x7f8   :  { %v826_v0 = vadd.f32 %v825_v63, %v824_v62 }
 0x7fa   :  { %827 = vrot.lane.b32.xlu0 %v826_v0, %s1216_s1 }
 0x86c   :  { %v828_v1 = vpop.permute.xlu0 %827 }
 0x86d   :  { %v829_v2 = vadd.f32 %v828_v1, %v826_v0 }
 0x86f   :  { %830 = vrot.lane.b32.xlu1 %v829_v2, %s1217_s9 }
 0x8e1   :  { %v831_v3 = vpop.permute.xlu1 %830 }
 0x8e2   :  { %v832_v4 = vadd.f32 %v831_v3, %v829_v2 }
 0x8e4   :  { %833 = vrot.lane.b32.xlu0 %v832_v4, %s1218_s10  ;;  %s1220_s10 = smov 120  }
 0x956   :  { %v834_v5 = vpop.permute.xlu0 %833 }
 0x957   :  { %v835_v6 = vadd.f32 %v834_v5, %v832_v4 }
 0x959   :  { %836 = vrot.lane.b32.xlu1 %v835_v6, %s1219_s11 }
 0x9cb   :  { %v837_v7 = vpop.permute.xlu1 %836 }
 0x9cc   :  { %v838_v8 = vadd.f32 %v837_v7, %v835_v6 }
 0x9ce   :  { %v839_v9 = vmul.f32 0.001953125, %v838_v8 }
 0x9d0   :  { %v840_v10 = vadd.f32 1e-05, %v839_v9 }
 0x9d2   :  { %1213 = vrsqrt.f32 %v840_v10 }
 0x9dc   :  { %v1214_v12 = vpop.eup %1213 }
 0x9dd   :  { %v842_v13 = vmul.f32 %v1214_v12, %v782_v11 }
 0x9df   :  { %v847_v14 = vrot.slane %v842_v13, %v1323_v57 }
 0x9e1   :  { %v850_v16 = vmul.f32 %v847_v14, %v811_v48  ;;  %v849_v17 = vmul.f32 %v847_v14, %v810_v47  ;;  %v852_v18 = vmul.f32 %v847_v14, %v813_v50  ;;  %v851_v19 = vmul.f32 %v847_v14, %v812_v49 }
 0x9e3   :  { %v860_v20 = vadd.f32 %v1008_v15, %v850_v16  ;;  %v859_v21 = vadd.f32 %v1008_v15, %v849_v17  ;;  %v862_v24 = vadd.f32 %v1008_v15, %v852_v18  ;;  %v861_v25 = vadd.f32 %v1008_v15, %v851_v19 }
 0x9e5   :  { %v864_v22 = vmax.f32 %v860_v20, 0.0  ;;  %v863_v23 = vmax.f32 %v859_v21, 0.0  ;;  %v866_v26 = vmax.f32 %v862_v24, 0.0  ;;  %v865_v27 = vmax.f32 %v861_v25, 0.0 }
 0x9e7   :  { %873 = vrot.lane.b32.xlu1 %v864_v22, %s1220_s10  ;;  %871 = vrot.lane.b32.xlu0 %v863_v23, %s1220_s10 }
 0x9eb   :  { %877 = vrot.lane.b32.xlu1 %v866_v26, %s1220_s10  ;;  %875 = vrot.lane.b32.xlu0 %v865_v27, %s1220_s10 }
 0xa59   :  { %v874_v57 = vpop.permute.xlu1 %873  ;;  %v872_v28 = vpop.permute.xlu0 %871 }
 0xa5a   :  { %v884_v29 = vmax.f32 %v864_v22, %v874_v57  ;;  %v883_v30 = vmax.f32 %v863_v23, %v872_v28 }
 0xa5c   :  { %v893_v31 = vrot.slane %v884_v29, 1  ;;  %v892_v32 = vrot.slane %v883_v30, 1 }
 0xa5d   :  { %v878_v33 = vpop.permute.xlu1 %877  ;;  %v876_v34 = vpop.permute.xlu0 %875 }
 0xa5e   :  { %v894_v35 = vsel %vm891_vm2, %v892_v32, %v893_v31  ;;  %v886_v36 = vmax.f32 %v866_v26, %v878_v33  ;;  %v885_v37 = vmax.f32 %v865_v27, %v876_v34 }
 0xa5f   :  { %v905_v38 = vmax.f32 %v883_v30, %v894_v35 }
 0xa60   :  { %v897_v39 = vrot.slane %v886_v36, 1  ;;  %v895_v40 = vrot.slane %v885_v37, 1 }
 0xa61   :  { %909 = vst [vmem:[%s1464_s7] sm:$0xff] %v905_v38 }
 0xa62   :  { %v904_v41 = vsel %vm891_vm2, %v897_v39, %v892_v32  ;;  %v896_v42 = vsel %vm891_vm2, %v893_v31, %v895_v40  ;;  %v898_v43 = vsel %vm891_vm2, %v895_v40, %v897_v39 }
 0xa63   :  { %v908_v44 = vmax.f32 %v886_v36, %v904_v41  ;;  %v906_v45 = vmax.f32 %v884_v29, %v896_v42  ;;  %v907_v46 = vmax.f32 %v885_v37, %v898_v43 }
 0xa65   :  { %912 = vst [vmem:[%s1464_s7 + $0x18] sm:$0xff] %v908_v44  ;;  %910 = vst [vmem:[%s1464_s7 + $0x8] sm:$0xff] %v906_v45 }
 0xa66   :  { %911 = vst [vmem:[%s1464_s7 + $0x10] sm:$0xff] %v907_v46 }

</bundles_post_ra>
